<compile_context>
chip_gen: v7x
topology: tpu7x:2x2x1
jax: 0.10.0
libtpu: 0.0.40
codegen_flags: <defaults>
</compile_context>

<pallas_src>
import functools

import numpy as np

import jax
import jax.numpy as jnp
from jax.experimental import pallas as pl
from jax.experimental.pallas import tpu as pltpu

BN_EPS = 1e-5


# --------------------------------------------------------------------------
# kernels
# --------------------------------------------------------------------------
def _refine(g, w1, b1, w2, b2):
    # refinement = Linear -> ReLU -> Linear -> Sigmoid ; g: (B, C) f32
    h = jnp.dot(g, w1, preferred_element_type=jnp.float32) + b1
    h = jnp.maximum(h, 0.0)
    s = jnp.dot(h, w2, preferred_element_type=jnp.float32) + b2
    return jax.nn.sigmoid(s)


def _smr_eval_kernel(x_ref, w1_ref, b1_ref, w2_ref, b2_ref, xr_ref):
    """B_TILE samples per grid step: global pool -> gate -> x * gate."""
    x = x_ref[...].astype(jnp.float32)                    # (B, C, HW)
    hw = x.shape[-1]
    g = jnp.sum(x, axis=-1) * (1.0 / hw)                  # (B, C)
    s = _refine(g, w1_ref[...], b1_ref[...], w2_ref[...], b2_ref[...])
    xr_ref[...] = (x * s[:, :, None]).astype(xr_ref.dtype)


def _smr_train_heavy_kernel(x_ref, seg_ref, w1_ref, b1_ref, w2_ref, b2_ref,
                            xr_ref, g_ref, lp_ref, *, part_num, h, w):
    """B_TILE samples per grid step: part/global pools, gate, x * gate."""
    x = x_ref[...].astype(jnp.float32)                    # (B, C, HW)
    b, c, hw = x.shape
    plw = (h // part_num) * w

    # Global pool: one unmasked full-lane reduction of resident data.
    g = jnp.sum(x, axis=-1) * (1.0 / hw)                  # (B, C)

    # Part pools: one MXU matmul against the constant (HW, P) segment matrix
    # (MXU is idle in this memory-bound kernel).  Fallback to lane slicing if
    # C is not sublane-aligned (rare).
    if c % 8 == 0:
        pools = jnp.dot(x.reshape(b * c, hw), seg_ref[...],
                        preferred_element_type=jnp.float32)
        pools = pools.reshape(b, c, part_num)             # (B, C, P)
    else:
        pools = jnp.stack(
            [jnp.sum(x[:, :, p * plw:(p + 1) * plw], axis=-1)
             for p in range(part_num)], axis=-1)          # (B, C, P)
    lp = jnp.transpose(pools, (0, 2, 1)) * (1.0 / plw)    # (B, P, C)

    g_ref[...] = g[:, None, :].astype(g_ref.dtype)        # (B, 1, C)
    lp_ref[...] = lp.astype(lp_ref.dtype)                 # (B, P, C)

    s = _refine(g, w1_ref[...], b1_ref[...], w2_ref[...], b2_ref[...])
    xr_ref[...] = (x * s[:, :, None]).astype(xr_ref.dtype)


def _smr_head_kernel(g_ref, lp_ref, wl_ref, wcg_ref, wcl_ref, y_ref):
    """Tiny O(N*C) head: bottleneck BN + per-part Linear+BN + classifier."""
    g = g_ref[...]                                        # (N, C)
    mu = jnp.mean(g, axis=0, keepdims=True)
    var = jnp.mean((g - mu) ** 2, axis=0, keepdims=True)
    g_bn = (g - mu) * jax.lax.rsqrt(var + BN_EPS)
    y = jnp.dot(g_bn, wcg_ref[...], preferred_element_type=jnp.float32)  # (N, Kp)

    lp = jnp.transpose(lp_ref[...], (1, 0, 2))            # (P, N, C)  (tiny, one-shot)
    ll = jnp.einsum('pnc,pcd->pnd', lp, wl_ref[...],
                    preferred_element_type=jnp.float32)                  # (P, N, D)
    mu_l = jnp.mean(ll, axis=1, keepdims=True)
    var_l = jnp.mean((ll - mu_l) ** 2, axis=1, keepdims=True)
    l_bn = (ll - mu_l) * jax.lax.rsqrt(var_l + BN_EPS)                   # (P, N, D)
    yp = jnp.einsum('pnd,pdk->pnk', l_bn, wcl_ref[...],
                    preferred_element_type=jnp.float32)                  # (P, N, Kp)
    y_ref[...] = (y + jnp.sum(yp, axis=0)).astype(y_ref.dtype)


# --------------------------------------------------------------------------
# wrapper helpers
# --------------------------------------------------------------------------
def _vmem_capacity_bytes():
    try:
        info = pltpu.get_tpu_info()
        for name in ("vmem_capacity_bytes", "vmem_size_bytes", "vmem_bytes"):
            cap = getattr(info, name, None)
            if cap:
                return int(cap)
    except Exception:
        pass
    return 64 * 1024 * 1024          # conservative: v7x per-TensorCore VMEM


def _pick_batch_tile(n, per_sample_bytes, fixed_bytes, budget_bytes):
    """Largest divisor of n whose double-buffered block footprint fits the
    budget; prefer divisors that leave >= 4 grid steps (v7x has 2 TCs)."""
    divisors = [d for d in range(1, n + 1) if n % d == 0]
    fits = [d for d in divisors
            if fixed_bytes + 2 * d * per_sample_bytes <= budget_bytes]
    if not fits:
        return 1
    pipelined = [d for d in fits if n // d >= 4]
    return max(pipelined) if pipelined else max(fits)


def _segment_matrix(h, w, part_num):
    """(HW, P) 0/1 matrix; column p sums rows [p*part_len, (p+1)*part_len)."""
    part_len = h // part_num
    plw = part_len * w
    seg = np.zeros((h * w, part_num), np.float32)
    for p in range(part_num):
        seg[p * plw:(p + 1) * plw, p] = 1.0
    return jnp.asarray(seg)


def prepare_params(params):
    """One-time parameter prep: pad classifier columns to a multiple of 128 so
    the head kernel's y store is lane-dense (unmasked)."""
    p = dict(params)
    k = params["wcg"].shape[1]
    k_pad = ((k + 127) // 128) * 128
    p["wcg_pad"] = jnp.pad(params["wcg"], ((0, 0), (0, k_pad - k)))
    p["wcl_pad"] = jnp.pad(params["wcl"], ((0, 0), (0, 0), (0, k_pad - k)))
    p["num_classes"] = k
    return p


# --------------------------------------------------------------------------
# forward
# --------------------------------------------------------------------------
def smr_forward(x_nchw, params, *, training=False, part_num=8,
                xr_dtype=None, donate_x=False):
    """Pallas SMR forward. x_nchw: (N, C, H, W) in the PyTorch layout."""
    n, c, h, w = x_nchw.shape
    hw = h * w
    x = x_nchw.reshape(n, c, hw)       # layout-preserving flatten (lane-dense)
    xr_dtype = x.dtype if xr_dtype is None else jnp.dtype(xr_dtype)

    w1, b1, w2, b2 = params["w1"], params["b1"], params["w2"], params["b2"]

    def wspec(arr):                    # weight resident across the grid
        zeros = (0,) * arr.ndim
        return pl.BlockSpec(arr.shape, lambda i, _z=zeros: _z)

    # ---- generation-aware batch tile / VMEM budget --------------------------
    x_item = jnp.dtype(x.dtype).itemsize
    xr_item = jnp.dtype(xr_dtype).itemsize
    per_sample = c * hw * (x_item + xr_item)              # in + out stream
    if training:
        per_sample += (1 + part_num) * c * 4              # g + lp blocks (tiny)
    weight_bytes = sum(int(np.prod(a.shape)) * jnp.dtype(a.dtype).itemsize
                       for a in (w1, b1, w2, b2))
    if training:
        weight_bytes += hw * part_num * 4                 # segment matrix
    fixed_bytes = 2 * weight_bytes + (1 << 20)            # resident weights + slack
    cap = _vmem_capacity_bytes()
    budget = min(int(cap * 0.6), 96 << 20)
    b_tile = _pick_batch_tile(n, per_sample, fixed_bytes, budget)
    footprint = fixed_bytes + 2 * b_tile * per_sample
    vmem_limit = int(min(int(cap * 0.9), max(2 * footprint, 32 << 20)))

    grid = (n // b_tile,)
    sample_spec = pl.BlockSpec((b_tile, c, hw), lambda i: (i, 0, 0))
    xr_spec = pl.BlockSpec((b_tile, c, hw), lambda i: (i, 0, 0))
    cparams = pltpu.CompilerParams(
        dimension_semantics=("parallel",),                # megacore on v7x
        vmem_limit_bytes=vmem_limit,
    )

    if not training:
        alias = {0: 0} if (donate_x and xr_dtype == x.dtype) else {}
        xr = pl.pallas_call(
            _smr_eval_kernel,
            grid=grid,
            in_specs=[sample_spec, wspec(w1), wspec(b1), wspec(w2), wspec(b2)],
            out_specs=xr_spec,
            out_shape=jax.ShapeDtypeStruct((n, c, hw), xr_dtype),
            compiler_params=cparams,
            input_output_aliases=alias,
        )(x, w1, b1, w2, b2)
        return xr.reshape(n, c, h, w)

    seg = _segment_matrix(h, w, part_num)
    heavy = functools.partial(_smr_train_heavy_kernel,
                              part_num=part_num, h=h, w=w)
    xr, g3, lp = pl.pallas_call(
        heavy,
        grid=grid,
        in_specs=[sample_spec, wspec(seg), wspec(w1), wspec(b1),
                  wspec(w2), wspec(b2)],
        out_specs=(
            xr_spec,
            pl.BlockSpec((b_tile, 1, c), lambda i: (i, 0, 0)),
            pl.BlockSpec((b_tile, part_num, c), lambda i: (i, 0, 0)),
        ),
        out_shape=(
            jax.ShapeDtypeStruct((n, c, hw), xr_dtype),
            jax.ShapeDtypeStruct((n, 1, c), jnp.float32),
            jax.ShapeDtypeStruct((n, part_num, c), jnp.float32),
        ),
        compiler_params=cparams,
    )(x, seg, w1, b1, w2, b2)
    g = g3.reshape(n, c)

    # ---- tiny un-gridded head kernel ----------------------------------------
    if "wcg_pad" in params:            # padding hoisted into prepare_params()
        wcg_p, wcl_p, k = params["wcg_pad"], params["wcl_pad"], params["num_classes"]
    else:                              # fallback (prefer prepare_params once)
        k = params["wcg"].shape[1]
        k_pad = ((k + 127) // 128) * 128
        wcg_p = jnp.pad(params["wcg"], ((0, 0), (0, k_pad - k)))
        wcl_p = jnp.pad(params["wcl"], ((0, 0), (0, 0), (0, k_pad - k)))
    vmem = lambda: pl.BlockSpec(memory_space=pltpu.MemorySpace.VMEM)
    y_pad = pl.pallas_call(
        _smr_head_kernel,
        in_specs=[vmem() for _ in range(5)],
        out_specs=vmem(),
        out_shape=jax.ShapeDtypeStruct((n, wcg_p.shape[1]), jnp.float32),
    )(g, lp, params["wl"], wcg_p, wcl_p)
    y = y_pad[:, :k]

    return xr.reshape(n, c, h, w), g, y


# --------------------------------------------------------------------------
# plain-JAX reference mirroring the PyTorch forward (NCHW)
# --------------------------------------------------------------------------
def smr_reference(x_nchw, params, *, training=False, part_num=8):
    x = x_nchw.astype(jnp.float32)
    n, c, h, w = x.shape
    g = jnp.mean(x, axis=(2, 3))                                   # (N, C)
    hid = jax.nn.relu(g @ params["w1"] + params["b1"])
    s = jax.nn.sigmoid(hid @ params["w2"] + params["b2"])
    xr = x * s[:, :, None, None]
    if not training:
        return xr
    mu = jnp.mean(g, axis=0, keepdims=True)
    var = jnp.mean((g - mu) ** 2, axis=0, keepdims=True)
    g_bn = (g - mu) / jnp.sqrt(var + BN_EPS)
    part_len = h // part_num
    y = g_bn @ params["wcg"]
    for p in range(part_num):
        lp = jnp.mean(x[:, :, p * part_len:(p + 1) * part_len, :], axis=(2, 3))
        ll = lp @ params["wl"][p]
        mu_l = jnp.mean(ll, axis=0, keepdims=True)
        var_l = jnp.mean((ll - mu_l) ** 2, axis=0, keepdims=True)
        l_bn = (ll - mu_l) / jnp.sqrt(var_l + BN_EPS)
        y = y + l_bn @ params["wcl"][p]
    return xr, g, y


if __name__ == "__main__":
    # small shapes consistent with the module:
    # feature_dim=C=32, part_num=8 (H divisible by 8), part_dim=16, reduction=4
    N, C, H, W = 2, 32, 16, 16
    part_num, part_dim, reduction, num_classes = 8, 16, 4, 10
    Cr = C // reduction

    key = jax.random.PRNGKey(0)
    ks = jax.random.split(key, 8)
    x = jax.random.normal(ks[0], (N, C, H, W), jnp.float32)

    # deterministic parameter init (shapes from SMR.__init__); weights stored
    # transposed relative to torch.nn.Linear so kernels do plain (N,K)@(K,M).
    params = {
        "w1": jax.random.normal(ks[1], (C, Cr), jnp.float32) * 0.1,     # refinement[0].weight^T
        "b1": jax.random.normal(ks[2], (1, Cr), jnp.float32) * 0.1,     # refinement[0].bias
        "w2": jax.random.normal(ks[3], (Cr, C), jnp.float32) * 0.1,     # refinement[2].weight^T
        "b2": jax.random.normal(ks[4], (1, C), jnp.float32) * 0.1,      # refinement[2].bias
        "wl": jax.random.normal(ks[5], (part_num, C, part_dim), jnp.float32) * 0.05,  # l_conv weights^T
        "wcg": jax.random.normal(ks[6], (C, num_classes), jnp.float32) * 0.001,       # classifier (global slice)
        "wcl": jax.random.normal(ks[7], (part_num, part_dim, num_classes), jnp.float32) * 0.001,  # classifier (part slices)
    }
    params_p = prepare_params(params)   # one-time classifier padding hoist

    # --- eval branch (inference): x_refined only ---
    xr = smr_forward(x, params_p, training=False, part_num=part_num)
    xr = jax.block_until_ready(xr)
    xr_ref = smr_reference(x, params, training=False, part_num=part_num)
    assert xr.shape == (N, C, H, W)
    assert jnp.allclose(xr, xr_ref, rtol=1e-2, atol=1e-3)

    # --- eval branch with bf16 xr (halved write traffic; compute stays f32) ---
    xr_b = smr_forward(x, params_p, training=False, part_num=part_num,
                       xr_dtype=jnp.bfloat16)
    xr_b = jax.block_until_ready(xr_b)
    assert jnp.allclose(xr_b.astype(jnp.float32), xr_ref, rtol=2e-2, atol=2e-2)

    # --- training branch: (x_refined, g_feat, y) ---
    xr_t, gf_t, y_t = smr_forward(x, params_p, training=True, part_num=part_num)
    jax.block_until_ready((xr_t, gf_t, y_t))
    xr_r, gf_r, y_r = smr_reference(x, params, training=True, part_num=part_num)
    assert xr_t.shape == (N, C, H, W) and gf_t.shape == (N, C) and y_t.shape == (N, num_classes)
    assert jnp.allclose(xr_t, xr_r, rtol=1e-2, atol=1e-3)
    assert jnp.allclose(gf_t, gf_r, rtol=1e-2, atol=1e-3)
    assert jnp.allclose(y_t, y_r, rtol=1e-2, atol=1e-3)

    print("KERNEL_OK")
</pallas_src>

<mosaic_0001>
module attributes {stable_mosaic.version = 11 : i64} {
  func.func @_smr_eval_kernel(%arg0: i32, %arg1: memref<2x32x256xf32, #tpu.memory_space<vmem>>, %arg2: memref<32x8xf32, #tpu.memory_space<vmem>>, %arg3: memref<1x8xf32, #tpu.memory_space<vmem>>, %arg4: memref<8x32xf32, #tpu.memory_space<vmem>>, %arg5: memref<1x32xf32, #tpu.memory_space<vmem>>, %arg6: memref<2x32x256xf32, #tpu.memory_space<vmem>>) attributes {dimension_semantics = [#tpu.dimension_semantics<parallel>], iteration_bounds = array<i64: 1>, scalar_prefetch = 0 : i64, scratch_operands = 0 : i64, tpu.core_type = #tpu.core_type<tc>, window_params = [{transform_indices = @transform_0, window_bounds = array<i64: 2, 32, 256>}, {pipeline_mode = #tpu.pipeline_mode<synchronous>, transform_indices = @transform_1, window_bounds = array<i64: 32, 8>}, {pipeline_mode = #tpu.pipeline_mode<synchronous>, transform_indices = @transform_2, window_bounds = array<i64: 1, 8>}, {pipeline_mode = #tpu.pipeline_mode<synchronous>, transform_indices = @transform_3, window_bounds = array<i64: 8, 32>}, {pipeline_mode = #tpu.pipeline_mode<synchronous>, transform_indices = @transform_4, window_bounds = array<i64: 1, 32>}, {transform_indices = @transform_5, window_bounds = array<i64: 2, 32, 256>}]} {
    %c0 = arith.constant 0 : index
    %c0_0 = arith.constant 0 : index
    %c0_1 = arith.constant 0 : index
    %0 = vector.load %arg1[%c0, %c0_0, %c0_1] : memref<2x32x256xf32, #tpu.memory_space<vmem>>, vector<2x32x256xf32>
    %cst = arith.constant dense<0.000000e+00> : vector<2x32xf32>
    %1 = vector.multi_reduction <add>, %0, %cst [2] : vector<2x32x256xf32> to vector<2x32xf32>
    %cst_2 = arith.constant 3.906250e-03 : f32
    %2 = vector.broadcast %cst_2 : f32 to vector<2x32xf32>
    %3 = arith.mulf %1, %2 : vector<2x32xf32>
    %c0_3 = arith.constant 0 : index
    %c0_4 = arith.constant 0 : index
    %4 = vector.load %arg2[%c0_3, %c0_4] : memref<32x8xf32, #tpu.memory_space<vmem>>, vector<32x8xf32>
    %c0_5 = arith.constant 0 : index
    %c0_6 = arith.constant 0 : index
    %5 = vector.load %arg3[%c0_5, %c0_6] : memref<1x8xf32, #tpu.memory_space<vmem>>, vector<1x8xf32>
    %c0_7 = arith.constant 0 : index
    %c0_8 = arith.constant 0 : index
    %6 = vector.load %arg4[%c0_7, %c0_8] : memref<8x32xf32, #tpu.memory_space<vmem>>, vector<8x32xf32>
    %c0_9 = arith.constant 0 : index
    %c0_10 = arith.constant 0 : index
    %7 = vector.load %arg5[%c0_9, %c0_10] : memref<1x32xf32, #tpu.memory_space<vmem>>, vector<1x32xf32>
    %cst_11 = arith.constant dense<0.000000e+00> : vector<2x8xf32>
    %8 = tpu.matmul %3, %4, %cst_11 {dimension_numbers = #tpu.dot_dimension_numbers<[1], [0], [0], [1], [0, 0, 1, 1], [], []>} : vector<2x32xf32>, vector<32x8xf32>, vector<2x8xf32> -> vector<2x8xf32>
    %9 = vector.broadcast %5 : vector<1x8xf32> to vector<2x8xf32>
    %10 = arith.addf %8, %9 : vector<2x8xf32>
    %cst_12 = arith.constant 0.000000e+00 : f32
    %11 = vector.broadcast %cst_12 : f32 to vector<2x8xf32>
    %12 = arith.maximumf %10, %11 : vector<2x8xf32>
    %cst_13 = arith.constant dense<0.000000e+00> : vector<2x32xf32>
    %13 = tpu.matmul %12, %6, %cst_13 {dimension_numbers = #tpu.dot_dimension_numbers<[1], [0], [0], [1], [0, 0, 1, 1], [], []>} : vector<2x8xf32>, vector<8x32xf32>, vector<2x32xf32> -> vector<2x32xf32>
    %14 = vector.broadcast %7 : vector<1x32xf32> to vector<2x32xf32>
    %15 = arith.addf %13, %14 : vector<2x32xf32>
    %16 = arith.negf %15 : vector<2x32xf32>
    %17 = math.exp %16 : vector<2x32xf32>
    %cst_14 = arith.constant 1.000000e+00 : f32
    %18 = vector.broadcast %cst_14 : f32 to vector<2x32xf32>
    %19 = arith.addf %18, %17 : vector<2x32xf32>
    %20 = arith.divf %18, %19 : vector<2x32xf32>
    %21 = vector.shape_cast %20 : vector<2x32xf32> to vector<2x32x1xf32>
    %22 = vector.broadcast %21 : vector<2x32x1xf32> to vector<2x32x256xf32>
    %23 = arith.mulf %0, %22 : vector<2x32x256xf32>
    %c0_15 = arith.constant 0 : index
    %c0_16 = arith.constant 0 : index
    %c0_17 = arith.constant 0 : index
    %24 = vector.load %arg6[%c0_15, %c0_16, %c0_17] : memref<2x32x256xf32, #tpu.memory_space<vmem>>, vector<2x32x256xf32>
    tpu.vector_store %arg6[%c0_15, %c0_16, %c0_17], %23 {strides = array<i32>} : memref<2x32x256xf32, #tpu.memory_space<vmem>>, vector<2x32x256xf32>,
    return
  }
  func.func @transform_0(%arg0: i32) -> (i32, i32, i32) {
    %c0_i32 = arith.constant 0 : i32
    %c0_i32_0 = arith.constant 0 : i32
    %c0_i32_1 = arith.constant 0 : i32
    return %arg0, %c0_i32, %c0_i32_0 : i32, i32, i32
  }
  func.func @transform_1(%arg0: i32) -> (i32, i32) {
    %c0_i32 = arith.constant 0 : i32
    %c0_i32_0 = arith.constant 0 : i32
    %c0_i32_1 = arith.constant 0 : i32
    return %c0_i32, %c0_i32_0 : i32, i32
  }
  func.func @transform_2(%arg0: i32) -> (i32, i32) {
    %c0_i32 = arith.constant 0 : i32
    %c0_i32_0 = arith.constant 0 : i32
    %c0_i32_1 = arith.constant 0 : i32
    return %c0_i32, %c0_i32_0 : i32, i32
  }
  func.func @transform_3(%arg0: i32) -> (i32, i32) {
    %c0_i32 = arith.constant 0 : i32
    %c0_i32_0 = arith.constant 0 : i32
    %c0_i32_1 = arith.constant 0 : i32
    return %c0_i32, %c0_i32_0 : i32, i32
  }
  func.func @transform_4(%arg0: i32) -> (i32, i32) {
    %c0_i32 = arith.constant 0 : i32
    %c0_i32_0 = arith.constant 0 : i32
    %c0_i32_1 = arith.constant 0 : i32
    return %c0_i32, %c0_i32_0 : i32, i32
  }
  func.func @transform_5(%arg0: i32) -> (i32, i32, i32) {
    %c0_i32 = arith.constant 0 : i32
    %c0_i32_0 = arith.constant 0 : i32
    %c0_i32_1 = arith.constant 0 : i32
    return %arg0, %c0_i32, %c0_i32_0 : i32, i32, i32
  }
}

</mosaic_0001>

<bundles_post_ra>
// kernel: tpu_custom_call.1
= control target key start
LH: loop header
LB: loop body
LE: loop exit
PB: predicated region body
PF: predicated region fallthrough
CT: control target
= control target key end

     0   :  { %10 = vsyncpa [#allocation3], 0  ;;  %s652_s0 = inlined_call_operand.hbm [shape: f32[2,32,256], index: 0, kind: input, shape index: {}]   ;;  %s653_s1 = inlined_call_operand.vmem [shape: f32[32,8], index: 1, kind: input, shape index: {}]   ;;  %s654_s2 = inlined_call_operand.vmem [shape: f32[1,8], index: 2, kind: input, shape index: {}]   ;;  %s655_s3 = inlined_call_operand.vmem [shape: f32[8,32], index: 3, kind: input, shape index: {}]   ;;  %s656_s4 = inlined_call_operand.vmem [shape: f32[1,32], index: 4, kind: input, shape index: {}]   ;;  %s657_s5 = inlined_call_operand.hbm [shape: f32[2,32,256], index: 5, kind: output, shape index: {}]  }
   0x1   :  { %11 = vsyncpa [#allocation4], 0  ;;  %s492_s18 = smov [#allocation2]   ;;  %s444_s22 = scalar_lea.hbm %s652_s0, 2048 }
   0x2   :  { %s17_s19 = sshll.u32 %s492_s18, 4  ;;  %p445_p0 = scmp.ne.s32.totalorder %s652_s0, %s444_s22  ;;  %s18_s19 = int_to_ptr.vmem [resolvable:$true] %s17_s19 }
   0x3   :  { %p448_p1 = scmp.lt.u32.totalorder %s444_s22, %s652_s0 }
   0x5   :  { %p450_p2 = pnand %p448_p1, %p445_p0 }
   0x7   :  { %453 = shalt.err (!%p450_p2)
}
   0x8   :  { %s454_s27 = scalar_lea.vmem %s18_s19, 2048  ;;  %p459_p4 = scmp.lt.s32.totalorder %s18_s19, %s18_s19 }
   0x9   :  { %p455_p3 = scmp.ne.s32.totalorder %s18_s19, %s454_s27  ;;  %p460_p5 = scmp.lt.s32.totalorder %s454_s27, %s454_s27 }
   0xb   :  { %p461_p6 = por %p460_p5, %p459_p4 }
   0xd   :  { %p462_p7 = pnand %p461_p6, %p455_p3 }
   0xf   :  { %465 = shalt.err (!%p462_p7)
}
  0x10   :  { %s493_s28 = smov 256   ;;  %s494_s29 = smov 16  }
  0x11   :  { %23 = dma.hbm_to_vmem [thread:$0]  %s652_s0, 2048, %s18_s19, [#allocation3], %s493_s28, %s493_s28, %s494_s29  }
  0x12   :  { %488 = dma.done.wait [#allocation3], 2048  }
  0x13   :  { %489 = vsyncadd [#allocation3], 4294965248  ;;  %v544_v0 = vld [vmem:[#allocation2 + $0x40] sm:$0xff]  ;;  %v546_v1 = vld [vmem:[#allocation2 + $0x48] sm:$0xff]  ;;  %v495_v27 = vmov 0.0|0.0   ;;  %vm496_vm0 = vmmov 0   ;;  %v104_v32 = vlaneseq }
  0x14   :  { %v548_v2 = vld [vmem:[#allocation2] sm:$0xff]  ;;  %v63_v3 = vadd.f32 %v546_v1, %v544_v0  ;;  %v552_v4 = vld [vmem:[#allocation2 + $0x8] sm:$0xff]  ;;  %v554_v5 = vld [vmem:[#allocation2 + $0x50] sm:$0xff]  ;;  %427 = vmatprep.subr.bf16.mxu0 %v495_v27  ;;  %v497_v31 = vmov 0.0   ;;  %vm115_vm1 = vcmask 130112   ;;  %vm122_vm2 = vcmask 195712  }
  0x15   :  { %v556_v6 = vld [vmem:[#allocation2 + $0x58] sm:$0xff]  ;;  %v51_v7 = vadd.f32 %v552_v4, %v548_v2  ;;  %v560_v8 = vld [vmem:[#allocation2 + $0x10] sm:$0xff]  ;;  %v568_v12 = vld [vmem:[#allocation2 + $0x60] sm:$0xff]  ;;  %419 = vmatprep.mubr.msk.f32.mxu0 %vm496_vm0, %v497_v31  ;;  %422 = vmatprep.subr.mxu1 %v497_v31  ;;  %v105_v34 = vand.u32 127, %v104_v32  ;;  %v604_v39 = vshrl.u32 %v104_v32, 7  ;;  %vm129_vm3 = vcmask 261312  }
  0x16   :  { %v562_v9 = vld [vmem:[#allocation2 + $0x18] sm:$0xff]  ;;  %64 = vadd.xlane.f32.xlu1 %v63_v3  ;;  %v66_v10 = vadd.f32 %v556_v6, %v554_v5  ;;  %v570_v13 = vld [vmem:[#allocation2 + $0x68] sm:$0xff]  ;;  %v572_v14 = vld [vmem:[#allocation2 + $0x20] sm:$0xff]  ;;  %424 = vmatprep.mubr.msk.f32.mxu1 %vm496_vm0, %v497_v31  ;;  %vm150_vm4 = vcmask 1041409   ;;  %vm152_vm5 = vcmask 261120   ;;  %vm232_vm6 = vcmask 64512  }
  0x17   :  { %52 = vadd.xlane.f32.xlu0 %v51_v7  ;;  %v54_v11 = vadd.f32 %v562_v9, %v560_v8  ;;  %v574_v15 = vld [vmem:[#allocation2 + $0x28] sm:$0xff]  ;;  %v69_v16 = vadd.f32 %v570_v13, %v568_v12  ;;  %v580_v18 = vld [vmem:[#allocation2 + $0x70] sm:$0xff]  ;;  %v582_v19 = vld [vmem:[#allocation2 + $0x78] sm:$0xff]  ;;  %v110_v36 = vadd.s32 4294967288, %v105_v34  ;;  %v117_v38 = vadd.s32 4294967280, %v105_v34 }
  0x18   :  { %v57_v17 = vadd.f32 %v574_v15, %v572_v14  ;;  %v584_v20 = vld [vmem:[#allocation2 + $0x30] sm:$0xff]  ;;  %v586_v21 = vld [vmem:[#allocation2 + $0x38] sm:$0xff]  ;;  %v72_v22 = vadd.f32 %v582_v19, %v580_v18  ;;  %v83_v24 = vld [vmem:[%s653_s1] sm:$0xff]  ;;  %v124_v43 = vadd.s32 4294967272, %v105_v34  ;;  %v108_v47 = vsub.s32 %v105_v34, %v604_v39 }
  0x19   :  { %v60_v23 = vadd.f32 %v586_v21, %v584_v20  ;;  %v84_v25 = vld [vmem:[%s653_s1 + $0x8] sm:$0xff]  ;;  %v85_v28 = vld [vmem:[%s653_s1 + $0x10] sm:$0xff]  ;;  %v86_v29 = vld [vmem:[%s653_s1 + $0x18] sm:$0xff]  ;;  %v113_v41 = vsub.s32 %v110_v36, %v604_v39  ;;  %v120_v45 = vsub.s32 %v117_v38, %v604_v39  ;;  %v314_v38 = vsub.s32 0, %v604_v39 }
  0x1a   :  { %67 = vadd.xlane.f32.xlu1 %v66_v10  ;;  %v428_v26 = vpack.c.bf16 %v84_v25, %v83_v24  ;;  %v431_v30 = vpack.c.bf16 %v86_v29, %v85_v28  ;;  %v127_v54 = vsub.s32 %v124_v43, %v604_v39  ;;  %v88_v25 = vld [vmem:[%s655_s3] sm:$0xff] }
  0x1b   :  { %55 = vadd.xlane.f32.xlu0 %v54_v11  ;;  %423 = vmatpush3.msra.mxu1 %v88_v25  ;;  %v401_v31 = vld [vmem:[%s656_s4] ss:$0 sm:$0xff] }
  0x1c   :  { %429 = vmatpush3.bf16.msra.mxu0 %v428_v26  ;;  %v399_v26 = vld [vmem:[%s654_s2] ss:$0 sm:$0xff]  ;;  %s498_s2 = smov [#allocation5]  }
  0x1d   :  { %430 = vmatprep.subr.bf16.mxu0 %v495_v27  ;;  %s387_s3 = sshll.u32 %s498_s2, 4  ;;  %s388_s3 = int_to_ptr.vmem [resolvable:$true] %s387_s3 }
  0x1e   :  { %70 = vadd.xlane.f32.xlu1 %v69_v16  ;;  %s466_s4 = scalar_lea.vmem %s388_s3, 2048  ;;  %p471_p9 = scmp.lt.s32.totalorder %s388_s3, %s388_s3 }
  0x1f   :  { %58 = vadd.xlane.f32.xlu0 %v57_v17  ;;  %p467_p8 = scmp.ne.s32.totalorder %s388_s3, %s466_s4  ;;  %p472_p10 = scmp.lt.s32.totalorder %s466_s4, %s466_s4 }
  0x20   :  { %432 = vmatpush3.bf16.msra.mxu0 %v431_v30 }
  0x21   :  { %p473_p11 = por %p472_p10, %p471_p9 }
  0x22   :  { %73 = vadd.xlane.f32.xlu1 %v72_v22 }
  0x23   :  { %61 = vadd.xlane.f32.xlu0 %v60_v23  ;;  %p474_p12 = pnand %p473_p11, %p467_p8 }
  0xa3   :  { %v65_v33 = vpop.xlane.xlu1 %64 }
  0xa4   :  { %v53_v35 = vpop.xlane.xlu0 %52  ;;  %v79_v48 = vmul.f32 0.00390625, %v65_v33 }
  0xa5   :  { %v75_v51 = vmul.f32 0.00390625, %v53_v35 }
  0xa6   :  { %v134_v58 = vrot.slane %v79_v48, %v108_v47 }
  0xa7   :  { %v68_v37 = vpop.xlane.xlu1 %67  ;;  %v109_v62 = vrot.slane %v75_v51, %v108_v47 }
  0xa8   :  { %v56_v40 = vpop.xlane.xlu0 %55  ;;  %v80_v42 = vmul.f32 0.00390625, %v68_v37 }
  0xa9   :  { %v76_v44 = vmul.f32 0.00390625, %v56_v40 }
  0xaa   :  { %v138_v53 = vrot.slane %v80_v42, %v113_v41  ;;  %v333_v42 = vsub.s32 1, %v604_v39 }
  0xab   :  { %v71_v46 = vpop.xlane.xlu1 %70  ;;  %v114_v55 = vrot.slane %v76_v44, %v113_v41 }
  0xac   :  { %v81_v49 = vmul.f32 0.00390625, %v71_v46  ;;  %v59_v50 = vpop.xlane.xlu0 %58  ;;  %v139_v3 = vsel %vm115_vm1, %v138_v53, %v134_v58 }
  0xad   :  { %v77_v52 = vmul.f32 0.00390625, %v59_v50  ;;  %v116_v10 = vsel %vm115_vm1, %v114_v55, %v109_v62 }
  0xae   :  { %v143_v56 = vrot.slane %v81_v49, %v120_v45 }
  0xaf   :  { %v74_v57 = vpop.xlane.xlu1 %73  ;;  %v121_v59 = vrot.slane %v77_v52, %v120_v45 }
  0xb0   :  { %v82_v60 = vmul.f32 0.00390625, %v74_v57  ;;  %v62_v61 = vpop.xlane.xlu0 %61  ;;  %v144_v11 = vsel %vm122_vm2, %v143_v56, %v139_v3 }
  0xb1   :  { %v78_v63 = vmul.f32 0.00390625, %v62_v61  ;;  %v123_v17 = vsel %vm122_vm2, %v121_v59, %v116_v10 }
  0xb2   :  { %v148_v7 = vrot.slane %v82_v60, %v127_v54 }
  0xb3   :  { %v128_v16 = vrot.slane %v78_v63, %v127_v54 }
  0xb4   :  { %v149_v22 = vsel %vm129_vm3, %v148_v7, %v144_v11 }
  0xb5   :  { %v130_v23 = vsel %vm129_vm3, %v128_v16, %v123_v17 }
  0xb6   :  { %v151_v24 = vsel %vm150_vm4, %v149_v22, %v130_v23 }
  0xb7   :  { %420 = vmatmul.mubr.msk.f32.vlgmr.msra.gmra.mrb[0].mxu0 %vm152_vm5, %v151_v24 }
 0x18a   :  { %v221_v27 = vpop.f32.mrb[0].mxu0 }
 0x18b   :  { %v222_v28 = vadd.f32 %v399_v26, %v221_v27  ;;  %v421_v29 = vpop.f32.mrb[1].mxu0 }
 0x18d   :  { %v225_v30 = vmax.f32 %v222_v28, 0.0 }
 0x18f   :  { %425 = vmatmul.mubr.msk.f32.vlgmr.msra.gmra.mrb[0].mxu1 %vm232_vm6, %v225_v30 }
 0x262   :  { %v302_v32 = vpop.f32.mrb[0].mxu1 }
 0x263   :  { %v303_v33 = vadd.f32 %v401_v31, %v302_v32  ;;  %v426_v34 = vpop.f32.mrb[1].mxu1 }
 0x265   :  { %v403_v35 = vmul.f32 -1.442695, %v303_v33 }
 0x267   :  { %440 = vpow2.f32 %v403_v35 }
 0x271   :  { %v441_v36 = vpop.eup %440 }
 0x272   :  { %v309_v37 = vadd.f32 1.0, %v441_v36 }
 0x274   :  { %442 = vrcp.f32 %v309_v37 }
 0x27e   :  { %v443_v40 = vpop.eup %442 }
 0x27f   :  { %v315_v41 = vrot.slane %v443_v40, %v314_v38  ;;  %v334_v43 = vrot.slane %v443_v40, %v333_v42 }
 0x281   :  { %321 = vbcast.lane.b32.xlu1 %v315_v41, 264  ;;  %317 = vbcast.lane.b32.xlu0 %v315_v41, 256 }
 0x285   :  { %325 = vbcast.lane.b32.xlu1 %v315_v41, 272  ;;  %336 = vbcast.lane.b32.xlu0 %v334_v43, 256 }
 0x289   :  { %329 = vbcast.lane.b32.xlu1 %v315_v41, 280  ;;  %344 = vbcast.lane.b32.xlu0 %v334_v43, 272 }
 0x28d   :  { %340 = vbcast.lane.b32.xlu1 %v334_v43, 264 }
 0x291   :  { %348 = vbcast.lane.b32.xlu1 %v334_v43, 280 }
 0x2f3   :  { %v322_v44 = vpop.permute.xlu1 %321  ;;  %v318_v45 = vpop.permute.xlu0 %317 }
 0x2f4   :  { %v352_v46 = vmul.f32 %v322_v44, %v560_v8  ;;  %v353_v47 = vmul.f32 %v322_v44, %v562_v9  ;;  %v350_v48 = vmul.f32 %v318_v45, %v548_v2  ;;  %v351_v49 = vmul.f32 %v318_v45, %v552_v4 }
 0x2f6   :  { %368 = vst [vmem:[#allocation5 + $0x10] sm:$0xff] %v352_v46  ;;  %369 = vst [vmem:[#allocation5 + $0x18] sm:$0xff] %v353_v47 }
 0x2f7   :  { %366 = vst [vmem:[#allocation5] sm:$0xff] %v350_v48  ;;  %367 = vst [vmem:[#allocation5 + $0x8] sm:$0xff] %v351_v49  ;;  %v326_v39 = vpop.permute.xlu1 %325  ;;  %v337_v50 = vpop.permute.xlu0 %336 }
 0x2f8   :  { %v354_v51 = vmul.f32 %v326_v39, %v572_v14  ;;  %v355_v52 = vmul.f32 %v326_v39, %v574_v15  ;;  %v358_v53 = vmul.f32 %v337_v50, %v544_v0  ;;  %v359_v8 = vmul.f32 %v337_v50, %v546_v1 }
 0x2fa   :  { %370 = vst [vmem:[#allocation5 + $0x20] sm:$0xff] %v354_v51  ;;  %371 = vst [vmem:[#allocation5 + $0x28] sm:$0xff] %v355_v52 }
 0x2fb   :  { %374 = vst [vmem:[#allocation5 + $0x40] sm:$0xff] %v358_v53  ;;  %375 = vst [vmem:[#allocation5 + $0x48] sm:$0xff] %v359_v8  ;;  %v330_v2 = vpop.permute.xlu1 %329  ;;  %v345_v4 = vpop.permute.xlu0 %344 }
 0x2fc   :  { %v356_v9 = vmul.f32 %v330_v2, %v584_v20  ;;  %v357_v54 = vmul.f32 %v330_v2, %v586_v21  ;;  %v362_v55 = vmul.f32 %v345_v4, %v568_v12  ;;  %v363_v14 = vmul.f32 %v345_v4, %v570_v13 }
 0x2fe   :  { %372 = vst [vmem:[#allocation5 + $0x30] sm:$0xff] %v356_v9  ;;  %373 = vst [vmem:[#allocation5 + $0x38] sm:$0xff] %v357_v54 }
 0x2ff   :  { %378 = vst [vmem:[#allocation5 + $0x60] sm:$0xff] %v362_v55  ;;  %379 = vst [vmem:[#allocation5 + $0x68] sm:$0xff] %v363_v14  ;;  %v341_v0 = vpop.permute.xlu1 %340 }
 0x300   :  { %v360_v1 = vmul.f32 %v341_v0, %v554_v5  ;;  %v361_v15 = vmul.f32 %v341_v0, %v556_v6 }
 0x302   :  { %376 = vst [vmem:[#allocation5 + $0x50] sm:$0xff] %v360_v1  ;;  %377 = vst [vmem:[#allocation5 + $0x58] sm:$0xff] %v361_v15 }
 0x303   :  { %v349_v20 = vpop.permute.xlu1 %348 }
 0x304   :  { %v364_v21 = vmul.f32 %v349_v20, %v580_v18  ;;  %v365_v12 = vmul.f32 %v349_v20, %v582_v19 }
 0x306   :  { %380 = vst [vmem:[#allocation5 + $0x70] sm:$0xff] %v364_v21  ;;  %381 = vst [vmem:[#allocation5 + $0x78] sm:$0xff] %v365_v12 }
 0x307   :  { %477 = shalt.err (!%p474_p12)
}
 0x308   :  { %s478_s21 = scalar_lea.hbm %s657_s5, 2048 }
 0x309   :  { %p479_p13 = scmp.ne.s32.totalorder %s657_s5, %s478_s21  ;;  %p482_p0 = scmp.lt.u32.totalorder %s478_s21, %s657_s5 }
 0x30b   :  { %p484_p1 = pnand %p482_p0, %p479_p13 }
 0x30d   :  { %487 = shalt.err (!%p484_p1)
}
 0x30e   :  { %393 = dma.vmem_to_hbm [thread:$0]  %s388_s3, 2048, %s657_s5, [#allocation4], %s493_s28, %s493_s28, %s494_s29  }
 0x30f   :  { %490 = dma.done.wait [#allocation4], 2048  }
 0x310   :  { %491 = vsyncadd [#allocation4], 4294965248 }
 0x311   :  { %397 = vsyncpa [#allocation3], 1 }
 0x312   :  { %398 = vsyncpa [#allocation4], 1 }

</bundles_post_ra>
